<compile_context>
chip_gen: v7x
topology: tpu7x:2x2x1
jax: 0.10.0
libtpu: 0.0.40
codegen_flags: <defaults>
</compile_context>

<pallas_src>
import functools

import jax
import jax.numpy as jnp
from jax.experimental import pallas as pl
from jax.experimental.pallas import tpu as pltpu


# ----------------------------------------------------------------------------
# In-kernel fold helper: element-wise accumulation into lane-wide VMEM scratch.
# ----------------------------------------------------------------------------
def _fold_into_acc(x_ref, sum_acc, max_acc, valid_cols, lane):
    """Accumulate columns [0, valid_cols) of the current x tile into the lane-wide
    running sum / max accumulators.  `valid_cols` and `lane` are static."""
    n_chunks = valid_cols // lane
    partial = valid_cols - n_chunks * lane
    n_pairs = n_chunks // 2

    if n_pairs > 0:
        # Visible loop (moderate unroll) over pairs of lane-wide chunks; one
        # scratch read-modify-write per pair keeps store-slot pressure low.
        def body(p, carry):
            lo = pl.multiple_of(p * (2 * lane), lane)
            c0 = x_ref[:, :, pl.ds(lo, lane)].astype(jnp.float32)
            c1 = x_ref[:, :, pl.ds(lo + lane, lane)].astype(jnp.float32)
            sum_acc[...] = sum_acc[...] + (c0 + c1)
            max_acc[...] = jnp.maximum(max_acc[...], jnp.maximum(c0, c1))
            return carry

        jax.lax.fori_loop(0, n_pairs, body, 0, unroll=min(4, n_pairs))

    if n_chunks % 2 == 1:
        lo = (n_chunks - 1) * lane
        c = x_ref[:, :, lo:lo + lane].astype(jnp.float32)
        sum_acc[...] = sum_acc[...] + c
        max_acc[...] = jnp.maximum(max_acc[...], c)

    if partial > 0:
        # Static, narrow remainder chunk: only the valid columns are touched.
        lo = n_chunks * lane
        c = x_ref[:, :, lo:lo + partial].astype(jnp.float32)
        sum_acc[:, :, 0:partial] = sum_acc[:, :, 0:partial] + c
        max_acc[:, :, 0:partial] = jnp.maximum(max_acc[:, :, 0:partial], c)


# ----------------------------------------------------------------------------
# Path A: fused kernel (pooling + FC + sigmoid), used when there are >= 1 batch
# blocks on the parallel axis.
# ----------------------------------------------------------------------------
def _ca_fused_kernel(x_ref, w1_ref, b1_ref, w2_ref, b2_ref, out_ref,
                     sum_acc, max_acc, *, hw_total, t_hw, lane, last_valid):
    # x_ref: (bB, C, tHW)   w1: (C, Cr)  b1: (1, Cr)  w2: (Cr, C)  b2: (1, C)
    # out_ref: (bB, C)      sum_acc/max_acc: (bB, C, lane) f32
    k = pl.program_id(1)
    n_k = pl.num_programs(1)

    @pl.when(k == 0)
    def _init():
        sum_acc[...] = jnp.zeros_like(sum_acc)
        max_acc[...] = jnp.full(max_acc.shape, -jnp.inf, dtype=max_acc.dtype)

    if last_valid == t_hw:
        # HW divides the tiling: single unmasked path on every step.
        _fold_into_acc(x_ref, sum_acc, max_acc, t_hw, lane)
    else:
        @pl.when(k < n_k - 1)
        def _full_tiles():
            _fold_into_acc(x_ref, sum_acc, max_acc, t_hw, lane)

        @pl.when(k == n_k - 1)
        def _last_tile():
            _fold_into_acc(x_ref, sum_acc, max_acc, last_valid, lane)

    @pl.when(k == n_k - 1)
    def _finalize():
        bb = out_ref.shape[0]
        # Single XLU lane-collapse per pooled quantity.
        avg = jnp.sum(sum_acc[...], axis=-1) * (1.0 / hw_total)   # (bB, C) f32
        mx = jnp.max(max_acc[...], axis=-1)                       # (bB, C) f32

        w1 = w1_ref[...].astype(jnp.float32)
        b1 = b1_ref[...].astype(jnp.float32)
        w2 = w2_ref[...].astype(jnp.float32)
        b2 = b2_ref[...].astype(jnp.float32)

        # Fused FC over stacked [avg; max] rows: one MXU issue per layer.
        v = jnp.concatenate([avg, mx], axis=0)                    # (2*bB, C)
        h = jnp.maximum(jnp.dot(v, w1, preferred_element_type=jnp.float32) + b1, 0.0)
        y = jnp.dot(h, w2, preferred_element_type=jnp.float32) + b2
        out = jax.nn.sigmoid(y[:bb, :] + y[bb:, :])
        out_ref[...] = out.astype(out_ref.dtype)


# ----------------------------------------------------------------------------
# Path B: pooling-only kernel with the HW reduction split across a leading
# "parallel" axis (keeps both megacore TensorCores busy when B is tiny).
# The per-core partial pools are combined + fed to the tiny FC in plain JAX.
# ----------------------------------------------------------------------------
def _ca_partial_kernel(x_ref, sum_out_ref, max_out_ref, sum_acc, max_acc,
                       *, t_hw, lane, last_valid, kpp):
    # x_ref: (B, C, tHW)  sum_out/max_out: (B, C)  sum_acc/max_acc: (B, C, lane) f32
    p = pl.program_id(0)
    k = pl.program_id(1)
    n_par = pl.num_programs(0)

    @pl.when(k == 0)
    def _init():
        sum_acc[...] = jnp.zeros_like(sum_acc)
        max_acc[...] = jnp.full(max_acc.shape, -jnp.inf, dtype=max_acc.dtype)

    if last_valid == t_hw:
        _fold_into_acc(x_ref, sum_acc, max_acc, t_hw, lane)
    else:
        is_last_global = jnp.logical_and(p == n_par - 1, k == kpp - 1)

        @pl.when(jnp.logical_not(is_last_global))
        def _full_tiles():
            _fold_into_acc(x_ref, sum_acc, max_acc, t_hw, lane)

        @pl.when(is_last_global)
        def _last_tile():
            _fold_into_acc(x_ref, sum_acc, max_acc, last_valid, lane)

    @pl.when(k == kpp - 1)
    def _finalize():
        sum_out_ref[...] = jnp.sum(sum_acc[...], axis=-1)
        max_out_ref[...] = jnp.max(max_acc[...], axis=-1)


# ----------------------------------------------------------------------------
# Wrapper: generation-aware tiling and path selection.
# ----------------------------------------------------------------------------
def _vmem_capacity_bytes():
    cap = None
    try:
        cap = int(pltpu.get_tpu_info().vmem_capacity_bytes)
    except Exception:
        cap = None
    if not cap or cap < (16 << 20) or cap > (1 << 30):
        cap = 64 << 20  # conservative fallback, safe on every generation (v7x: 64 MiB/TC)
    return cap


def _pick_batch_block(b):
    # Output block's second-to-last dim must be a multiple of 8 or equal B.
    if b <= 8 or b % 8 != 0:
        return b
    return 8


def _pick_hw_tile(hw, bb, c, itemsize, budget, override=None):
    """HW tile width: a multiple of 128 (or the full HW).  Sized so the pipelined
    x stream (2 buffers) stays within `budget` bytes of VMEM."""
    if override is not None:
        t = min(int(override), hw)
        if t >= hw:
            return hw
        return max(128, (t // 128) * 128)
    if hw <= 512:
        return hw
    max_t = max(128, budget // (2 * bb * c * itemsize))
    cap_lanes = 32768                       # keep per-tile fold loops modest
    if min(max_t, cap_lanes) >= hw:
        return hw                           # whole HW fits in one resident tile
    t = min(hw, max_t, cap_lanes)
    return max(128, (t // 128) * 128)


def _x_block_spec(block_shape, index_map, deep_buffer):
    if deep_buffer:
        try:
            return pl.BlockSpec(block_shape, index_map, pipeline_mode=pl.Buffered(3))
        except TypeError:
            pass                            # older API: fall back to default 2-deep
    return pl.BlockSpec(block_shape, index_map)


def _fc_sigmoid(avg, mx, w1, b1, w2, b2):
    def fc(v):
        h = jnp.maximum(v @ w1 + b1, 0.0)
        return h @ w2 + b2
    return jax.nn.sigmoid(fc(avg) + fc(mx))


def channel_attention(x, w1, b1, w2, b2, *, hw_tile=None):
    """x: (B, C, H, W) NCHW.  Returns sigmoid channel-attention weights (B, C, 1, 1)."""
    B, C, H, W = x.shape
    HW = H * W
    Cr = w1.shape[1]
    x_flat = x.reshape(B, C, HW)
    b1_2d = b1.reshape(1, Cr)
    b2_2d = b2.reshape(1, C)

    vmem_cap = _vmem_capacity_bytes()
    x_budget = (vmem_cap * 3) // 8          # bytes for the double-buffered x stream
    vmem_limit = max(32 << 20, min(vmem_cap // 2, 96 << 20))

    bB = _pick_batch_block(B)
    n_bblk = B // bB
    tHW = _pick_hw_tile(HW, bB, C, x.dtype.itemsize, x_budget, override=hw_tile)
    lane = min(128, tHW)
    n_k = pl.cdiv(HW, tHW)
    last_valid = HW - (n_k - 1) * tHW       # valid columns of the last HW tile

    tile_bytes = bB * C * tHW * x.dtype.itemsize
    small_tile = tile_bytes <= (2 << 20)

    # Small-batch megacore path: a single batch block would leave the second
    # TensorCore idle, so split the HW reduction across a 2-wide parallel axis.
    split_hw = (n_bblk == 1) and (n_k >= 2) and (n_k % 2 == 0)

    compiler_params = pltpu.CompilerParams(
        dimension_semantics=("parallel", "arbitrary"),
        vmem_limit_bytes=vmem_limit)

    if split_hw:
        n_par = 2
        kpp = n_k // n_par
        kernel = functools.partial(_ca_partial_kernel, t_hw=tHW, lane=lane,
                                   last_valid=last_valid, kpp=kpp)
        sum_p, max_p = pl.pallas_call(
            kernel,
            out_shape=(jax.ShapeDtypeStruct((n_par, B, C), jnp.float32),
                       jax.ShapeDtypeStruct((n_par, B, C), jnp.float32)),
            grid_spec=pltpu.PrefetchScalarGridSpec(
                num_scalar_prefetch=0,
                grid=(n_par, kpp),
                in_specs=[
                    _x_block_spec((B, C, tHW),
                                  lambda p, k: (0, 0, p * kpp + k),
                                  small_tile and kpp >= 3),
                ],
                out_specs=(pl.BlockSpec((None, B, C), lambda p, k: (p, 0, 0)),
                           pl.BlockSpec((None, B, C), lambda p, k: (p, 0, 0))),
                scratch_shapes=[pltpu.VMEM((B, C, lane), jnp.float32),
                                pltpu.VMEM((B, C, lane), jnp.float32)]),
            compiler_params=compiler_params,
        )(x_flat)
        avg = jnp.sum(sum_p, axis=0) * (1.0 / HW)
        mx = jnp.max(max_p, axis=0)
        out = _fc_sigmoid(avg, mx, w1, b1, w2, b2).astype(x.dtype)
    else:
        kernel = functools.partial(_ca_fused_kernel, hw_total=HW, t_hw=tHW,
                                   lane=lane, last_valid=last_valid)
        out = pl.pallas_call(
            kernel,
            out_shape=jax.ShapeDtypeStruct((B, C), x.dtype),
            grid_spec=pltpu.PrefetchScalarGridSpec(
                num_scalar_prefetch=0,
                grid=(n_bblk, n_k),
                in_specs=[
                    _x_block_spec((bB, C, tHW),
                                  lambda b, k: (b, 0, k),
                                  small_tile and n_k >= 3),
                    # Tiny FC parameters: constant block index -> fetched once, resident.
                    pl.BlockSpec((C, Cr), lambda b, k: (0, 0)),
                    pl.BlockSpec((1, Cr), lambda b, k: (0, 0)),
                    pl.BlockSpec((Cr, C), lambda b, k: (0, 0)),
                    pl.BlockSpec((1, C), lambda b, k: (0, 0)),
                ],
                out_specs=pl.BlockSpec((bB, C), lambda b, k: (b, 0)),
                scratch_shapes=[pltpu.VMEM((bB, C, lane), jnp.float32),
                                pltpu.VMEM((bB, C, lane), jnp.float32)]),
            compiler_params=compiler_params,
        )(x_flat, w1, b1_2d, w2, b2_2d)

    return out.reshape(B, C, 1, 1)


# ----------------------------------------------------------------------------
# Reference & self-test.
# ----------------------------------------------------------------------------
def _reference(x, w1, b1, w2, b2):
    """Pure-JAX reference mirroring the PyTorch forward pass."""
    avg = jnp.mean(x, axis=(2, 3))
    mx = jnp.max(x, axis=(2, 3))
    out = _fc_sigmoid(avg, mx, w1, b1, w2, b2)
    return out.reshape(x.shape[0], x.shape[1], 1, 1)


def _run_case(key, B, C, H, W, reduction_ratio, hw_tile):
    Cr = max(1, C // reduction_ratio)
    kx, k1, kb1, k2, kb2 = jax.random.split(key, 5)
    x = jax.random.normal(kx, (B, C, H, W), dtype=jnp.float32)
    w1 = jax.random.normal(k1, (C, Cr), dtype=jnp.float32) * 0.2
    b1 = jax.random.normal(kb1, (Cr,), dtype=jnp.float32) * 0.05
    w2 = jax.random.normal(k2, (Cr, C), dtype=jnp.float32) * 0.2
    b2 = jax.random.normal(kb2, (C,), dtype=jnp.float32) * 0.05

    out = jax.block_until_ready(channel_attention(x, w1, b1, w2, b2, hw_tile=hw_tile))
    ref = _reference(x, w1, b1, w2, b2)
    assert out.shape == (B, C, 1, 1), out.shape
    max_err = float(jnp.max(jnp.abs(out - ref)))
    assert jnp.allclose(out, ref, atol=1e-5, rtol=1e-5), (
        "mismatch (B=%d C=%d H=%d W=%d tile=%s): max abs err = %e"
        % (B, C, H, W, str(hw_tile), max_err))


if __name__ == "__main__":
    key = jax.random.PRNGKey(0)
    k1, k2, k3 = jax.random.split(key, 3)
    # 1) Headline small shape, natural tiling: single resident HW tile, fused FC path.
    _run_case(k1, B=2, C=8, H=24, W=24, reduction_ratio=2, hw_tile=None)
    # 2) Same shape with a forced 512-lane tile: exercises the small-batch megacore
    #    split (partial-pool kernel + JAX epilogue) and last-step remainder masking.
    _run_case(k2, B=2, C=8, H=24, W=24, reduction_ratio=2, hw_tile=512)
    # 3) Multi batch-block fused path: 2 parallel batch blocks x 4 sequential HW
    #    steps, masking only on the final step, pair-wise fold loop, 3-deep pipeline.
    _run_case(k3, B=16, C=8, H=40, W=40, reduction_ratio=2, hw_tile=512)
    print("KERNEL_OK")
</pallas_src>

<mosaic_0001>
module attributes {stable_mosaic.version = 11 : i64} {
  func.func @_ca_fused_kernel(%arg0: i32, %arg1: i32, %arg2: memref<2x8x576xf32, #tpu.memory_space<vmem>>, %arg3: memref<8x4xf32, #tpu.memory_space<vmem>>, %arg4: memref<1x4xf32, #tpu.memory_space<vmem>>, %arg5: memref<4x8xf32, #tpu.memory_space<vmem>>, %arg6: memref<1x8xf32, #tpu.memory_space<vmem>>, %arg7: memref<2x8xf32, #tpu.memory_space<vmem>>, %arg8: memref<2x8x128xf32, #tpu.memory_space<vmem>>, %arg9: memref<2x8x128xf32, #tpu.memory_space<vmem>>) attributes {dimension_semantics = [#tpu.dimension_semantics<parallel>, #tpu.dimension_semantics<arbitrary>], iteration_bounds = array<i64: 1, 1>, scalar_prefetch = 0 : i64, scratch_operands = 2 : i64, tpu.core_type = #tpu.core_type<tc>, window_params = [{transform_indices = @transform_0, window_bounds = array<i64: 2, 8, 576>}, {pipeline_mode = #tpu.pipeline_mode<synchronous>, transform_indices = @transform_1, window_bounds = array<i64: 8, 4>}, {pipeline_mode = #tpu.pipeline_mode<synchronous>, transform_indices = @transform_2, window_bounds = array<i64: 1, 4>}, {pipeline_mode = #tpu.pipeline_mode<synchronous>, transform_indices = @transform_3, window_bounds = array<i64: 4, 8>}, {pipeline_mode = #tpu.pipeline_mode<synchronous>, transform_indices = @transform_4, window_bounds = array<i64: 1, 8>}, {transform_indices = @transform_5, window_bounds = array<i64: 2, 8>}]} {
    %c0_i32 = arith.constant 0 : i32
    %0 = arith.cmpi eq, %arg1, %c0_i32 : i32
    %1 = arith.extui %0 : i1 to i32
    %c0_i32_0 = arith.constant 0 : i32
    %2 = arith.cmpi ne, %1, %c0_i32_0 : i32
    scf.if %2 {
      %cst = arith.constant 0.000000e+00 : f32
      %43 = vector.broadcast %cst : f32 to vector<2x8x128xf32>
      %c0_51 = arith.constant 0 : index
      %c0_52 = arith.constant 0 : index
      %c0_53 = arith.constant 0 : index
      %44 = vector.load %arg8[%c0_51, %c0_52, %c0_53] : memref<2x8x128xf32, #tpu.memory_space<vmem>>, vector<2x8x128xf32>
      tpu.vector_store %arg8[%c0_51, %c0_52, %c0_53], %43 {strides = array<i32>} : memref<2x8x128xf32, #tpu.memory_space<vmem>>, vector<2x8x128xf32>,
      %cst_54 = arith.constant 0xFF800000 : f32
      %45 = vector.broadcast %cst_54 : f32 to vector<2x8x128xf32>
      %c0_55 = arith.constant 0 : index
      %c0_56 = arith.constant 0 : index
      %c0_57 = arith.constant 0 : index
      %46 = vector.load %arg9[%c0_55, %c0_56, %c0_57] : memref<2x8x128xf32, #tpu.memory_space<vmem>>, vector<2x8x128xf32>
      tpu.vector_store %arg9[%c0_55, %c0_56, %c0_57], %45 {strides = array<i32>} : memref<2x8x128xf32, #tpu.memory_space<vmem>>, vector<2x8x128xf32>,
    } else {
    }
    %c0_i32_1 = arith.constant 0 : i32
    %c256_i32 = arith.constant 256 : i32
    %3 = arith.muli %c0_i32_1, %c256_i32 : i32
    %4 = tpu.assume_multiple %3, 128 : i32
    %c0 = arith.constant 0 : index
    %c0_2 = arith.constant 0 : index
    %5 = arith.index_cast %4 : i32 to index
    %6 = vector.load %arg2[%c0, %c0_2, %5] : memref<2x8x576xf32, #tpu.memory_space<vmem>>, vector<2x8x128xf32>
    %c128_i32 = arith.constant 128 : i32
    %7 = arith.addi %4, %c128_i32 : i32
    %c0_3 = arith.constant 0 : index
    %c0_4 = arith.constant 0 : index
    %8 = arith.index_cast %7 : i32 to index
    %9 = vector.load %arg2[%c0_3, %c0_4, %8] : memref<2x8x576xf32, #tpu.memory_space<vmem>>, vector<2x8x128xf32>
    %c0_5 = arith.constant 0 : index
    %c0_6 = arith.constant 0 : index
    %c0_7 = arith.constant 0 : index
    %10 = vector.load %arg8[%c0_5, %c0_6, %c0_7] : memref<2x8x128xf32, #tpu.memory_space<vmem>>, vector<2x8x128xf32>
    %11 = arith.addf %6, %9 : vector<2x8x128xf32>
    %12 = arith.addf %10, %11 : vector<2x8x128xf32>
    %c0_8 = arith.constant 0 : index
    %c0_9 = arith.constant 0 : index
    %c0_10 = arith.constant 0 : index
    %13 = vector.load %arg8[%c0_8, %c0_9, %c0_10] : memref<2x8x128xf32, #tpu.memory_space<vmem>>, vector<2x8x128xf32>
    tpu.vector_store %arg8[%c0_8, %c0_9, %c0_10], %12 {strides = array<i32>} : memref<2x8x128xf32, #tpu.memory_space<vmem>>, vector<2x8x128xf32>,
    %c0_11 = arith.constant 0 : index
    %c0_12 = arith.constant 0 : index
    %c0_13 = arith.constant 0 : index
    %14 = vector.load %arg9[%c0_11, %c0_12, %c0_13] : memref<2x8x128xf32, #tpu.memory_space<vmem>>, vector<2x8x128xf32>
    %15 = arith.maximumf %6, %9 : vector<2x8x128xf32>
    %16 = arith.maximumf %14, %15 : vector<2x8x128xf32>
    %c0_14 = arith.constant 0 : index
    %c0_15 = arith.constant 0 : index
    %c0_16 = arith.constant 0 : index
    %17 = vector.load %arg9[%c0_14, %c0_15, %c0_16] : memref<2x8x128xf32, #tpu.memory_space<vmem>>, vector<2x8x128xf32>
    tpu.vector_store %arg9[%c0_14, %c0_15, %c0_16], %16 {strides = array<i32>} : memref<2x8x128xf32, #tpu.memory_space<vmem>>, vector<2x8x128xf32>,
    %c1_i32 = arith.constant 1 : i32
    %c256_i32_17 = arith.constant 256 : i32
    %18 = arith.muli %c1_i32, %c256_i32_17 : i32
    %19 = tpu.assume_multiple %18, 128 : i32
    %c0_18 = arith.constant 0 : index
    %c0_19 = arith.constant 0 : index
    %20 = arith.index_cast %19 : i32 to index
    %21 = vector.load %arg2[%c0_18, %c0_19, %20] : memref<2x8x576xf32, #tpu.memory_space<vmem>>, vector<2x8x128xf32>
    %c128_i32_20 = arith.constant 128 : i32
    %22 = arith.addi %19, %c128_i32_20 : i32
    %c0_21 = arith.constant 0 : index
    %c0_22 = arith.constant 0 : index
    %23 = arith.index_cast %22 : i32 to index
    %24 = vector.load %arg2[%c0_21, %c0_22, %23] : memref<2x8x576xf32, #tpu.memory_space<vmem>>, vector<2x8x128xf32>
    %c0_23 = arith.constant 0 : index
    %c0_24 = arith.constant 0 : index
    %c0_25 = arith.constant 0 : index
    %25 = vector.load %arg8[%c0_23, %c0_24, %c0_25] : memref<2x8x128xf32, #tpu.memory_space<vmem>>, vector<2x8x128xf32>
    %26 = arith.addf %21, %24 : vector<2x8x128xf32>
    %27 = arith.addf %25, %26 : vector<2x8x128xf32>
    %c0_26 = arith.constant 0 : index
    %c0_27 = arith.constant 0 : index
    %c0_28 = arith.constant 0 : index
    %28 = vector.load %arg8[%c0_26, %c0_27, %c0_28] : memref<2x8x128xf32, #tpu.memory_space<vmem>>, vector<2x8x128xf32>
    tpu.vector_store %arg8[%c0_26, %c0_27, %c0_28], %27 {strides = array<i32>} : memref<2x8x128xf32, #tpu.memory_space<vmem>>, vector<2x8x128xf32>,
    %c0_29 = arith.constant 0 : index
    %c0_30 = arith.constant 0 : index
    %c0_31 = arith.constant 0 : index
    %29 = vector.load %arg9[%c0_29, %c0_30, %c0_31] : memref<2x8x128xf32, #tpu.memory_space<vmem>>, vector<2x8x128xf32>
    %30 = arith.maximumf %21, %24 : vector<2x8x128xf32>
    %31 = arith.maximumf %29, %30 : vector<2x8x128xf32>
    %c0_32 = arith.constant 0 : index
    %c0_33 = arith.constant 0 : index
    %c0_34 = arith.constant 0 : index
    %32 = vector.load %arg9[%c0_32, %c0_33, %c0_34] : memref<2x8x128xf32, #tpu.memory_space<vmem>>, vector<2x8x128xf32>
    tpu.vector_store %arg9[%c0_32, %c0_33, %c0_34], %31 {strides = array<i32>} : memref<2x8x128xf32, #tpu.memory_space<vmem>>, vector<2x8x128xf32>,
    %c2_i32 = arith.constant 2 : i32
    %c0_35 = arith.constant 0 : index
    %c0_36 = arith.constant 0 : index
    %c512 = arith.constant 512 : index
    %33 = vector.load %arg2[%c0_35, %c0_36, %c512] : memref<2x8x576xf32, #tpu.memory_space<vmem>>, vector<2x8x64xf32>
    %c0_37 = arith.constant 0 : index
    %c0_38 = arith.constant 0 : index
    %c0_39 = arith.constant 0 : index
    %34 = vector.load %arg8[%c0_37, %c0_38, %c0_39] : memref<2x8x128xf32, #tpu.memory_space<vmem>>, vector<2x8x64xf32>
    %35 = arith.addf %34, %33 : vector<2x8x64xf32>
    %c0_40 = arith.constant 0 : index
    %c0_41 = arith.constant 0 : index
    %c0_42 = arith.constant 0 : index
    %36 = vector.load %arg8[%c0_40, %c0_41, %c0_42] : memref<2x8x128xf32, #tpu.memory_space<vmem>>, vector<2x8x64xf32>
    tpu.vector_store %arg8[%c0_40, %c0_41, %c0_42], %35 {strides = array<i32>} : memref<2x8x128xf32, #tpu.memory_space<vmem>>, vector<2x8x64xf32>,
    %c0_43 = arith.constant 0 : index
    %c0_44 = arith.constant 0 : index
    %c0_45 = arith.constant 0 : index
    %37 = vector.load %arg9[%c0_43, %c0_44, %c0_45] : memref<2x8x128xf32, #tpu.memory_space<vmem>>, vector<2x8x64xf32>
    %38 = arith.maximumf %37, %33 : vector<2x8x64xf32>
    %c0_46 = arith.constant 0 : index
    %c0_47 = arith.constant 0 : index
    %c0_48 = arith.constant 0 : index
    %39 = vector.load %arg9[%c0_46, %c0_47, %c0_48] : memref<2x8x128xf32, #tpu.memory_space<vmem>>, vector<2x8x64xf32>
    tpu.vector_store %arg9[%c0_46, %c0_47, %c0_48], %38 {strides = array<i32>} : memref<2x8x128xf32, #tpu.memory_space<vmem>>, vector<2x8x64xf32>,
    %c0_i32_49 = arith.constant 0 : i32
    %40 = arith.cmpi eq, %arg1, %c0_i32_49 : i32
    %41 = arith.extui %40 : i1 to i32
    %c0_i32_50 = arith.constant 0 : i32
    %42 = arith.cmpi ne, %41, %c0_i32_50 : i32
    scf.if %42 {
      %c0_51 = arith.constant 0 : index
      %c0_52 = arith.constant 0 : index
      %c0_53 = arith.constant 0 : index
      %43 = vector.load %arg8[%c0_51, %c0_52, %c0_53] : memref<2x8x128xf32, #tpu.memory_space<vmem>>, vector<2x8x128xf32>
      %cst = arith.constant dense<0.000000e+00> : vector<2x8xf32>
      %44 = vector.multi_reduction <add>, %43, %cst [2] : vector<2x8x128xf32> to vector<2x8xf32>
      %cst_54 = arith.constant 0.00173611112 : f32
      %45 = vector.broadcast %cst_54 : f32 to vector<2x8xf32>
      %46 = arith.mulf %44, %45 : vector<2x8xf32>
      %c0_55 = arith.constant 0 : index
      %c0_56 = arith.constant 0 : index
      %c0_57 = arith.constant 0 : index
      %47 = vector.load %arg9[%c0_55, %c0_56, %c0_57] : memref<2x8x128xf32, #tpu.memory_space<vmem>>, vector<2x8x128xf32>
      %cst_58 = arith.constant dense<0xFF800000> : vector<2x8xf32>
      %48 = vector.multi_reduction <maximumf>, %47, %cst_58 [2] : vector<2x8x128xf32> to vector<2x8xf32>
      %c0_59 = arith.constant 0 : index
      %c0_60 = arith.constant 0 : index
      %49 = vector.load %arg3[%c0_59, %c0_60] : memref<8x4xf32, #tpu.memory_space<vmem>>, vector<8x4xf32>
      %c0_61 = arith.constant 0 : index
      %c0_62 = arith.constant 0 : index
      %50 = vector.load %arg4[%c0_61, %c0_62] : memref<1x4xf32, #tpu.memory_space<vmem>>, vector<1x4xf32>
      %c0_63 = arith.constant 0 : index
      %c0_64 = arith.constant 0 : index
      %51 = vector.load %arg5[%c0_63, %c0_64] : memref<4x8xf32, #tpu.memory_space<vmem>>, vector<4x8xf32>
      %c0_65 = arith.constant 0 : index
      %c0_66 = arith.constant 0 : index
      %52 = vector.load %arg6[%c0_65, %c0_66] : memref<1x8xf32, #tpu.memory_space<vmem>>, vector<1x8xf32>
      %53 = tpu.concatenate %46, %48 in 0 : vector<2x8xf32>, vector<2x8xf32> -> vector<4x8xf32>
      %cst_67 = arith.constant dense<0.000000e+00> : vector<4x4xf32>
      %54 = tpu.matmul %53, %49, %cst_67 {dimension_numbers = #tpu.dot_dimension_numbers<[1], [0], [0], [1], [0, 0, 1, 1], [], []>} : vector<4x8xf32>, vector<8x4xf32>, vector<4x4xf32> -> vector<4x4xf32>
      %55 = vector.broadcast %50 : vector<1x4xf32> to vector<4x4xf32>
      %56 = arith.addf %54, %55 : vector<4x4xf32>
      %cst_68 = arith.constant 0.000000e+00 : f32
      %57 = vector.broadcast %cst_68 : f32 to vector<4x4xf32>
      %58 = arith.maximumf %56, %57 : vector<4x4xf32>
      %cst_69 = arith.constant dense<0.000000e+00> : vector<4x8xf32>
      %59 = tpu.matmul %58, %51, %cst_69 {dimension_numbers = #tpu.dot_dimension_numbers<[1], [0], [0], [1], [0, 0, 1, 1], [], []>} : vector<4x4xf32>, vector<4x8xf32>, vector<4x8xf32> -> vector<4x8xf32>
      %60 = vector.broadcast %52 : vector<1x8xf32> to vector<4x8xf32>
      %61 = arith.addf %59, %60 : vector<4x8xf32>
      %62 = vector.extract_strided_slice %61 {offsets = [0, 0], sizes = [2, 8], strides = [1, 1]} : vector<4x8xf32> to vector<2x8xf32>
      %63 = vector.extract_strided_slice %61 {offsets = [2, 0], sizes = [2, 8], strides = [1, 1]} : vector<4x8xf32> to vector<2x8xf32>
      %64 = arith.addf %62, %63 : vector<2x8xf32>
      %65 = arith.negf %64 : vector<2x8xf32>
      %66 = math.exp %65 : vector<2x8xf32>
      %cst_70 = arith.constant 1.000000e+00 : f32
      %67 = vector.broadcast %cst_70 : f32 to vector<2x8xf32>
      %68 = arith.addf %67, %66 : vector<2x8xf32>
      %69 = arith.divf %67, %68 : vector<2x8xf32>
      %c0_71 = arith.constant 0 : index
      %c0_72 = arith.constant 0 : index
      %70 = vector.load %arg7[%c0_71, %c0_72] : memref<2x8xf32, #tpu.memory_space<vmem>>, vector<2x8xf32>
      tpu.vector_store %arg7[%c0_71, %c0_72], %69 {strides = array<i32>} : memref<2x8xf32, #tpu.memory_space<vmem>>, vector<2x8xf32>,
    } else {
    }
    return
  }
  func.func @transform_0(%arg0: i32, %arg1: i32) -> (i32, i32, i32) {
    %c0_i32 = arith.constant 0 : i32
    %c0_i32_0 = arith.constant 0 : i32
    return %arg0, %c0_i32, %arg1 : i32, i32, i32
  }
  func.func @transform_1(%arg0: i32, %arg1: i32) -> (i32, i32) {
    %c0_i32 = arith.constant 0 : i32
    %c0_i32_0 = arith.constant 0 : i32
    %c0_i32_1 = arith.constant 0 : i32
    return %c0_i32, %c0_i32_0 : i32, i32
  }
  func.func @transform_2(%arg0: i32, %arg1: i32) -> (i32, i32) {
    %c0_i32 = arith.constant 0 : i32
    %c0_i32_0 = arith.constant 0 : i32
    %c0_i32_1 = arith.constant 0 : i32
    return %c0_i32, %c0_i32_0 : i32, i32
  }
  func.func @transform_3(%arg0: i32, %arg1: i32) -> (i32, i32) {
    %c0_i32 = arith.constant 0 : i32
    %c0_i32_0 = arith.constant 0 : i32
    %c0_i32_1 = arith.constant 0 : i32
    return %c0_i32, %c0_i32_0 : i32, i32
  }
  func.func @transform_4(%arg0: i32, %arg1: i32) -> (i32, i32) {
    %c0_i32 = arith.constant 0 : i32
    %c0_i32_0 = arith.constant 0 : i32
    %c0_i32_1 = arith.constant 0 : i32
    return %c0_i32, %c0_i32_0 : i32, i32
  }
  func.func @transform_5(%arg0: i32, %arg1: i32) -> (i32, i32) {
    %c0_i32 = arith.constant 0 : i32
    %c0_i32_0 = arith.constant 0 : i32
    return %arg0, %c0_i32 : i32, i32
  }
}

</mosaic_0001>

<bundles_post_ra>
// kernel: tpu_custom_call.1
= control target key start
LH: loop header
LB: loop body
LE: loop exit
PB: predicated region body
PF: predicated region fallthrough
CT: control target
= control target key end

     0   :  { %10 = vsyncpa [#allocation5], 0  ;;  %s507_s0 = inlined_call_operand.hbm [shape: f32[2,8,576], index: 0, kind: input, shape index: {}]   ;;  %s508_s1 = inlined_call_operand.vmem [shape: f32[8,4], index: 1, kind: input, shape index: {}]   ;;  %s509_s2 = inlined_call_operand.vmem [shape: f32[1,4], index: 2, kind: input, shape index: {}]   ;;  %s510_s3 = inlined_call_operand.vmem [shape: f32[4,8], index: 3, kind: input, shape index: {}]   ;;  %s511_s4 = inlined_call_operand.vmem [shape: f32[1,8], index: 4, kind: input, shape index: {}]   ;;  %s512_s5 = inlined_call_operand.hbm [shape: f32[2,8], index: 5, kind: output, shape index: {}]  }
   0x1   :  { %11 = vsyncpa [#allocation6], 0  ;;  %s435_s18 = smov [#allocation4]   ;;  %s387_s22 = scalar_lea.hbm %s507_s0, 1280 }
   0x2   :  { %s17_s19 = sshll.u32 %s435_s18, 4  ;;  %p388_p0 = scmp.ne.s32.totalorder %s507_s0, %s387_s22  ;;  %s18_s19 = int_to_ptr.vmem [resolvable:$true] %s17_s19 }
   0x3   :  { %p391_p1 = scmp.lt.u32.totalorder %s387_s22, %s507_s0 }
   0x5   :  { %p393_p2 = pnand %p391_p1, %p388_p0 }
   0x7   :  { %396 = shalt.err (!%p393_p2)
}
   0x8   :  { %s397_s27 = scalar_lea.vmem %s18_s19, 1280  ;;  %p402_p4 = scmp.lt.s32.totalorder %s18_s19, %s18_s19 }
   0x9   :  { %p398_p3 = scmp.ne.s32.totalorder %s18_s19, %s397_s27  ;;  %p403_p5 = scmp.lt.s32.totalorder %s397_s27, %s397_s27 }
   0xb   :  { %p404_p6 = por %p403_p5, %p402_p4 }
   0xd   :  { %p405_p7 = pnand %p404_p6, %p398_p3 }
   0xf   :  { %408 = shalt.err (!%p405_p7)
}
  0x10   :  { %s436_s28 = smov 640   ;;  %s437_s29 = smov 40  }
  0x11   :  { %23 = dma.hbm_to_vmem [thread:$0]  %s507_s0, 1280, %s18_s19, [#allocation5], %s436_s28, %s436_s28, %s437_s29  }
  0x12   :  { %431 = dma.done.wait [#allocation5], 1280  }
  0x13   :  { %432 = vsyncadd [#allocation5], 4294966016  ;;  %v438_v0 = vmov 0.0   ;;  %v43_v1 = vld [vmem:[#allocation4] sm:$0xff]  ;;  %v50_v2 = vld [vmem:[#allocation4 + $0x8] sm:$0xff]  ;;  %vm100_vm0 = vcmask 523264   ;;  %v132_v32 = vlaneseq }
  0x14   :  { %366 = vmatprep.subr.mxu0 %v438_v0  ;;  %371 = vmatprep.subr.mxu1 %v438_v0  ;;  %v69_v3 = vld [vmem:[#allocation4 + $0x10] sm:$0xff]  ;;  %v62_v4 = vmax.f32 %v43_v1, %v50_v2  ;;  %v76_v5 = vld [vmem:[#allocation4 + $0x18] sm:$0xff]  ;;  %v54_v6 = vadd.f32 %v50_v2, %v43_v1  ;;  %v44_v7 = vld [vmem:[#allocation4 + $0x28] sm:$0xff]  ;;  %vm439_vm1 = vmmov 0   ;;  %vm155_vm2 = vcmask 1043459  }
  0x15   :  { %v88_v8 = vmax.f32 %v69_v3, %v76_v5  ;;  %v80_v9 = vadd.f32 %v76_v5, %v69_v3  ;;  %v51_v10 = vld [vmem:[#allocation4 + $0x30] sm:$0xff]  ;;  %v70_v11 = vld [vmem:[#allocation4 + $0x38] sm:$0xff]  ;;  %v77_v12 = vld [vmem:[#allocation4 + $0x40] sm:$0xff]  ;;  %368 = vmatprep.mubr.msk.f32.mxu0 %vm439_vm1, %v438_v0  ;;  %373 = vmatprep.mubr.msk.f32.mxu1 %vm439_vm1, %v438_v0  ;;  %v133_v33 = vand.u32 127, %v132_v32  ;;  %v135_v34 = vshrl.u32 %v132_v32, 7 }
  0x16   :  { %v63_v13 = vmax.f32 %v44_v7, %v51_v10  ;;  %v89_v14 = vmax.f32 %v70_v11, %v77_v12  ;;  %v94_v15 = vld [vmem:[#allocation4 + $0x20] sm:$0xff]  ;;  %v55_v16 = vadd.f32 %v51_v10, %v44_v7  ;;  %v81_v17 = vadd.f32 %v77_v12, %v70_v11  ;;  %v95_v20 = vld [vmem:[#allocation4 + $0x48] sm:$0xff] }
  0x17   :  { %v90_v18 = vmax.f32 %v62_v4, %v88_v8  ;;  %v82_v19 = vadd.f32 %v80_v9, %v54_v6  ;;  %v126_v31 = vld [vmem:[%s508_s1] sm:$0xff]  ;;  %v136_v37 = vsub.s32 %v133_v33, %v135_v34  ;;  %vm142_vm3 = vcmask 1041409  }
  0x18   :  { %v91_v23 = vmax.f32 %v63_v13, %v89_v14  ;;  %v83_v24 = vadd.f32 %v81_v17, %v55_v16  ;;  %367 = vmatpush3.msra.mxu0 %v126_v31  ;;  %vm158_vm4 = vcmask 1041408   ;;  %vm166_vm5 = vcmask 64512   ;;  %v128_v49 = vld [vmem:[%s510_s3] sm:$0xf] }
  0x19   :  { %92 = vst [vmem:[#allocation3] sm:$0xff] %v90_v18  ;;  %v105_v21 = vmax.f32 %v90_v18, %v94_v15  ;;  %84 = vst [vmem:[#allocation2] sm:$0xff] %v82_v19  ;;  %v98_v22 = vadd.f32 %v94_v15, %v82_v19  ;;  %vm251_vm6 = vcmask 1043456   ;;  %v356_v50 = vld [vmem:[%s509_s2] ss:$0 sm:$0xff]  ;;  %vm247_vm7 = vcmask 31744  }
  0x1a   :  { %93 = vst [vmem:[#allocation3 + $0x8] sm:$0xff] %v91_v23  ;;  %v106_v25 = vmax.f32 %v91_v23, %v95_v20  ;;  %85 = vst [vmem:[#allocation2 + $0x8] sm:$0xff] %v83_v24  ;;  %v99_v26 = vadd.f32 %v95_v20, %v83_v24  ;;  %372 = vmatpush3.msk.msra.mxu1 %vm251_vm6, %v128_v49  ;;  %v358_v55 = vld [vmem:[%s511_s4] ss:$0 sm:$0xff]  ;;  %s440_s2 = smov [#allocation7]   ;;  %vm335_vm8 = vcmask 58368  }
  0x1b   :  { %107 = vst.msk [vmem:[#allocation3] sm:$0xff] %vm100_vm0, %v105_v21  ;;  %101 = vst.msk [vmem:[#allocation2] sm:$0xff] %vm100_vm0, %v98_v22  ;;  %s343_s3 = sshll.u32 %s440_s2, 4  ;;  %s344_s3 = int_to_ptr.vmem [resolvable:$true] %s343_s3 }
  0x1c   :  { %108 = vst.msk [vmem:[#allocation3 + $0x8] sm:$0xff] %vm100_vm0, %v106_v25  ;;  %102 = vst.msk [vmem:[#allocation2 + $0x8] sm:$0xff] %vm100_vm0, %v99_v26  ;;  %s409_s13 = scalar_lea.vmem %s344_s3, 32  ;;  %p414_p9 = scmp.lt.s32.totalorder %s344_s3, %s344_s3 }
  0x1d   :  { %p410_p8 = scmp.ne.s32.totalorder %s344_s3, %s409_s13  ;;  %p415_p10 = scmp.lt.s32.totalorder %s409_s13, %s409_s13 }
  0x1f   :  { %p416_p11 = por %p415_p10, %p414_p9 }
  0x21   :  { %p417_p12 = pnand %p416_p11, %p410_p8 }
  0x22   :  { %v120_v27 = vld [vmem:[#allocation3] sm:$0xff]  ;;  %v112_v28 = vld [vmem:[#allocation2] sm:$0xff] }
  0x23   :  { %122 = vmax.xlane.f32.xlu1 %v120_v27  ;;  %114 = vadd.xlane.f32.xlu0 %v112_v28  ;;  %v121_v29 = vld [vmem:[#allocation3 + $0x8] sm:$0xff]  ;;  %v113_v30 = vld [vmem:[#allocation2 + $0x8] sm:$0xff] }
  0x27   :  { %124 = vmax.xlane.f32.xlu1 %v121_v29  ;;  %116 = vadd.xlane.f32.xlu0 %v113_v30 }
  0xb0   :  { %v123_v35 = vpop.xlane.xlu1 %122  ;;  %v115_v36 = vpop.xlane.xlu0 %114 }
  0xb1   :  { %v118_v38 = vmul.f32 0.0017361111, %v115_v36  ;;  %v150_v43 = vrot.slane %v123_v35, %v136_v37 }
  0xb3   :  { %v137_v44 = vrot.slane %v118_v38, %v136_v37 }
  0xb4   :  { %v125_v39 = vpop.xlane.xlu1 %124  ;;  %v117_v40 = vpop.xlane.xlu0 %116 }
  0xb5   :  { %v154_v41 = vrot.slane %v125_v39, %v136_v37  ;;  %v119_v42 = vmul.f32 0.0017361111, %v117_v40 }
  0xb7   :  { %v141_v45 = vrot.slane %v119_v42, %v136_v37  ;;  %v156_v46 = vsel %vm155_vm2, %v154_v41, %v150_v43 }
  0xb9   :  { %v143_v47 = vsel %vm142_vm3, %v141_v45, %v137_v44 }
  0xba   :  { %v159_v48 = vsel %vm158_vm4, %v143_v47, %v156_v46 }
  0xbb   :  { %369 = vmatmul.mubr.msk.f32.vlgmr.msra.gmra.mrb[0].mxu0 %vm166_vm5, %v159_v48 }
 0x18e   :  { %v236_v51 = vpop.f32.mrb[0].mxu0 }
 0x18f   :  { %v237_v52 = vadd.f32 %v356_v50, %v236_v51  ;;  %v370_v53 = vpop.f32.mrb[1].mxu0 }
 0x191   :  { %v240_v54 = vmax.f32 %v237_v52, 0.0 }
 0x193   :  { %374 = vmatmul.mubr.msk.f32.vlgmr.msra.gmra.mrb[0].mxu1 %vm247_vm7, %v240_v54 }
 0x266   :  { %v321_v56 = vpop.f32.mrb[0].mxu1 }
 0x267   :  { %v322_v57 = vadd.f32 %v358_v55, %v321_v56  ;;  %v375_v58 = vpop.f32.mrb[1].mxu1 }
 0x269   :  { %v326_v59 = vrot.slane %v322_v57, 2 }
 0x26b   :  { %v328_v60 = vadd.f32 %v326_v59, %v322_v57 }
 0x26d   :  { %v361_v61 = vmul.f32 -1.442695, %v328_v60 }
 0x26f   :  { %383 = vpow2.f32 %v361_v61 }
 0x279   :  { %v384_v62 = vpop.eup %383 }
 0x27a   :  { %v332_v63 = vadd.f32 1.0, %v384_v62 }
 0x27c   :  { %385 = vrcp.f32 %v332_v63 }
 0x286   :  { %v386_v0 = vpop.eup %385 }
 0x287   :  { %336 = vst.msk [vmem:[#allocation7] sm:$0x3] %vm335_vm8, %v386_v0 }
 0x288   :  { %420 = shalt.err (!%p417_p12)
}
 0x289   :  { %s421_s15 = scalar_lea.hbm %s512_s5, 32 }
 0x28a   :  { %p422_p13 = scmp.ne.s32.totalorder %s512_s5, %s421_s15  ;;  %p425_p0 = scmp.lt.u32.totalorder %s421_s15, %s512_s5 }
 0x28c   :  { %p427_p1 = pnand %p425_p0, %p422_p13 }
 0x28e   :  { %430 = shalt.err (!%p427_p1)
}
 0x28f   :  { %346 = dma.vmem_to_hbm [thread:$0]  %s344_s3, 32, %s512_s5, [#allocation6]  }
 0x290   :  { %433 = dma.done.wait [#allocation6], 32  }
 0x291   :  { %434 = vsyncadd [#allocation6], 4294967264 }
 0x292   :  { %350 = vsyncpa [#allocation5], 1 }
 0x293   :  { %351 = vsyncpa [#allocation6], 1 }

</bundles_post_ra>
